<compile_context>
chip_gen: v7x
topology: tpu7x:2x2x1
jax: 0.10.0
libtpu: 0.0.40
codegen_flags: <defaults>
</compile_context>

<pallas_src>
import jax
import jax.numpy as jnp
from jax.experimental import pallas as pl
from jax.experimental.pallas import tpu as pltpu

_SUBLANE = 8


def lstm_kernel(x_ref, wih_ref, whh_ref, b_ref, wfc_ref, bfc_ref, out_ref):
    # x_ref:   (S*Bp, I)  bf16  time-major input, batch padded to Bp (mult of 8)
    # wih_ref: (I, 4H)    bf16  (= W_ih^T)
    # whh_ref: (H, 4H)    bf16  (= W_hh^T)
    # b_ref:   (1, 4H)    f32   (= b_ih + b_hh)
    # wfc_ref: (1, H)     f32   (= W_fc row)
    # bfc_ref: (1,)       f32   (SMEM scalar)
    # out_ref: (Bp, 1)    f32   (wrapper slices back to the first B rows)
    SBp, _ = x_ref.shape
    H = whh_ref.shape[0]
    Bp = out_ref.shape[0]
    S = SBp // Bp

    whh = whh_ref[...]  # bf16, held in vregs across the whole time loop

    # Hoisted input projection + fused bias: one batched bf16 MXU matmul with
    # f32 accumulation, outside the serial recurrence.
    xw_all = (
        jnp.dot(x_ref[...], wih_ref[...], preferred_element_type=jnp.float32)
        + b_ref[...]
    )                                         # (S*Bp, 4H) f32, gate order i,f,g,o
    # Tile-aligned leading-axis view: each xw_all[t] is a clean (8, 4H) block.
    xw_all = xw_all.reshape(S, Bp, 4 * H)

    h = jnp.zeros((Bp, H), jnp.float32)
    c = jnp.zeros((Bp, H), jnp.float32)

    # Short sequence -> static unroll is fine (serial recurrence anyway).
    for t in range(S):
        gates = xw_all[t] + jnp.dot(
            h.astype(jnp.bfloat16), whh, preferred_element_type=jnp.float32
        )  # (Bp, 4H) f32

        # Two full-width EUP pushes per step, then static lane slices.
        sig_all = jax.nn.sigmoid(gates)
        tanh_all = jnp.tanh(gates)

        i_g = sig_all[:, 0 * H:1 * H]
        f_g = sig_all[:, 1 * H:2 * H]
        g_g = tanh_all[:, 2 * H:3 * H]
        o_g = sig_all[:, 3 * H:4 * H]

        c = f_g * c + i_g * g_g
        h = o_g * jnp.tanh(c)

    # Final linear layer (H -> 1): broadcast multiply + lane reduce (VPU/XLU),
    # not an N=1 MXU matmul.  Padded rows are computed but discarded outside.
    out = jnp.sum(h * wfc_ref[...], axis=-1, keepdims=True) + bfc_ref[0]
    out_ref[...] = out.astype(out_ref.dtype)


def simple_lstm_forward(x, params):
    """x: (batch, seq_len, input_size) float32 -> (batch, 1) float32."""
    w_ih, w_hh, b_ih, b_hh, w_fc, b_fc = (
        params["w_ih"], params["w_hh"], params["b_ih"],
        params["b_hh"], params["w_fc"], params["b_fc"],
    )
    B, S, I = x.shape
    H = w_hh.shape[1]
    Bp = max(_SUBLANE, ((B + _SUBLANE - 1) // _SUBLANE) * _SUBLANE)

    # Glue (plain JAX): time-major transpose, batch padding to a full sublane
    # tile, flatten, and weight pre-transposition / bf16 casts.
    xt = jnp.transpose(x, (1, 0, 2))                             # (S, B, I)
    xt = jnp.pad(xt, ((0, 0), (0, Bp - B), (0, 0)))              # (S, Bp, I)
    x_flat = xt.reshape(S * Bp, I).astype(jnp.bfloat16)          # (S*Bp, I)

    wih_t = w_ih.T.astype(jnp.bfloat16)                          # (I, 4H)
    whh_t = w_hh.T.astype(jnp.bfloat16)                          # (H, 4H)
    b_sum = (b_ih + b_hh).reshape(1, 4 * H).astype(jnp.float32)  # (1, 4H)
    wfc_row = w_fc.reshape(1, H).astype(jnp.float32)             # (1, H)
    bfc = b_fc.reshape(1).astype(jnp.float32)                    # (1,) scalar

    vmem = pl.BlockSpec(memory_space=pltpu.MemorySpace.VMEM)
    smem = pl.BlockSpec(memory_space=pltpu.MemorySpace.SMEM)
    out_pad = pl.pallas_call(
        lstm_kernel,
        out_shape=jax.ShapeDtypeStruct((Bp, 1), jnp.float32),
        in_specs=[vmem, vmem, vmem, vmem, vmem, smem],
        out_specs=vmem,
    )(x_flat, wih_t, whh_t, b_sum, wfc_row, bfc)
    # Padded rows develop nonzero (bias-driven) state; discard them explicitly.
    return out_pad[:B]


def init_params(key, input_size, hidden_size):
    k = jax.random.split(key, 6)
    s = 1.0 / jnp.sqrt(hidden_size)
    return {
        "w_ih": jax.random.uniform(k[0], (4 * hidden_size, input_size), jnp.float32, -s, s),
        "w_hh": jax.random.uniform(k[1], (4 * hidden_size, hidden_size), jnp.float32, -s, s),
        "b_ih": jax.random.uniform(k[2], (4 * hidden_size,), jnp.float32, -s, s),
        "b_hh": jax.random.uniform(k[3], (4 * hidden_size,), jnp.float32, -s, s),
        "w_fc": jax.random.uniform(k[4], (1, hidden_size), jnp.float32, -s, s),
        "b_fc": jax.random.uniform(k[5], (1,), jnp.float32, -s, s),
    }


def reference_forward(x, params):
    """Pure-JAX f32 reference mirroring torch.nn.LSTM + Linear semantics."""
    B, S, I = x.shape
    H = params["w_hh"].shape[1]
    h = jnp.zeros((B, H), jnp.float32)
    c = jnp.zeros((B, H), jnp.float32)
    for t in range(S):
        g = x[:, t, :] @ params["w_ih"].T + h @ params["w_hh"].T + params["b_ih"] + params["b_hh"]
        i_g = jax.nn.sigmoid(g[:, 0 * H:1 * H])
        f_g = jax.nn.sigmoid(g[:, 1 * H:2 * H])
        g_g = jnp.tanh(g[:, 2 * H:3 * H])
        o_g = jax.nn.sigmoid(g[:, 3 * H:4 * H])
        c = f_g * c + i_g * g_g
        h = o_g * jnp.tanh(c)
    return h @ params["w_fc"].T + params["b_fc"]


if __name__ == "__main__":
    batch, seq_len, input_size, hidden_size = 2, 8, 16, 32

    key = jax.random.PRNGKey(0)
    k_x, k_p = jax.random.split(key)
    x = jax.random.normal(k_x, (batch, seq_len, input_size), jnp.float32)
    params = init_params(k_p, input_size, hidden_size)

    out = simple_lstm_forward(x, params)
    out = jax.block_until_ready(out)

    ref = reference_forward(x, params)
    assert out.shape == (batch, 1), out.shape
    # bf16 MXU operands (f32 accumulation) -> slightly looser tolerance.
    assert jnp.allclose(out, ref, atol=2e-2, rtol=2e-2), (out, ref)

    print("KERNEL_OK")
</pallas_src>

<mosaic_0001>
module attributes {stable_mosaic.version = 11 : i64} {
  func.func @lstm_kernel(%arg0: memref<64x16xbf16, #tpu.memory_space<vmem>>, %arg1: memref<16x128xbf16, #tpu.memory_space<vmem>>, %arg2: memref<32x128xbf16, #tpu.memory_space<vmem>>, %arg3: memref<1x128xf32, #tpu.memory_space<vmem>>, %arg4: memref<1x32xf32, #tpu.memory_space<vmem>>, %arg5: memref<1xf32, #tpu.memory_space<smem>>, %arg6: memref<8x1xf32, #tpu.memory_space<vmem>>) attributes {dimension_semantics = [], scalar_prefetch = 0 : i64, scratch_operands = 0 : i64, tpu.core_type = #tpu.core_type<tc>} {
    %c0 = arith.constant 0 : index
    %c0_0 = arith.constant 0 : index
    %0 = vector.load %arg2[%c0, %c0_0] : memref<32x128xbf16, #tpu.memory_space<vmem>>, vector<32x128xbf16>
    %c0_1 = arith.constant 0 : index
    %c0_2 = arith.constant 0 : index
    %1 = vector.load %arg0[%c0_1, %c0_2] : memref<64x16xbf16, #tpu.memory_space<vmem>>, vector<64x16xbf16>
    %c0_3 = arith.constant 0 : index
    %c0_4 = arith.constant 0 : index
    %2 = vector.load %arg1[%c0_3, %c0_4] : memref<16x128xbf16, #tpu.memory_space<vmem>>, vector<16x128xbf16>
    %cst = arith.constant dense<0.000000e+00> : vector<64x128xf32>
    %3 = tpu.matmul %1, %2, %cst {dimension_numbers = #tpu.dot_dimension_numbers<[1], [0], [0], [1], [0, 0, 1, 1], [], []>} : vector<64x16xbf16>, vector<16x128xbf16>, vector<64x128xf32> -> vector<64x128xf32>
    %c0_5 = arith.constant 0 : index
    %c0_6 = arith.constant 0 : index
    %4 = vector.load %arg3[%c0_5, %c0_6] : memref<1x128xf32, #tpu.memory_space<vmem>>, vector<1x128xf32>
    %5 = vector.broadcast %4 : vector<1x128xf32> to vector<64x128xf32>
    %6 = arith.addf %3, %5 : vector<64x128xf32>
    %7 = vector.shape_cast %6 : vector<64x128xf32> to vector<8x8x128xf32>
    %cst_7 = arith.constant 0.000000e+00 : f32
    %8 = vector.broadcast %cst_7 : f32 to vector<8x32xf32>
    %cst_8 = arith.constant 0.000000e+00 : f32
    %9 = vector.broadcast %cst_8 : f32 to vector<8x32xf32>
    %10 = vector.extract_strided_slice %7 {offsets = [0, 0, 0], sizes = [1, 8, 128], strides = [1, 1, 1]} : vector<8x8x128xf32> to vector<1x8x128xf32>
    %11 = vector.shape_cast %10 : vector<1x8x128xf32> to vector<8x128xf32>
    %12 = arith.truncf %8 : vector<8x32xf32> to vector<8x32xbf16>
    %cst_9 = arith.constant dense<0.000000e+00> : vector<8x128xf32>
    %13 = tpu.matmul %12, %0, %cst_9 {dimension_numbers = #tpu.dot_dimension_numbers<[1], [0], [0], [1], [0, 0, 1, 1], [], []>} : vector<8x32xbf16>, vector<32x128xbf16>, vector<8x128xf32> -> vector<8x128xf32>
    %14 = arith.addf %11, %13 : vector<8x128xf32>
    %15 = arith.negf %14 : vector<8x128xf32>
    %16 = math.exp %15 : vector<8x128xf32>
    %cst_10 = arith.constant 1.000000e+00 : f32
    %17 = vector.broadcast %cst_10 : f32 to vector<8x128xf32>
    %18 = arith.addf %17, %16 : vector<8x128xf32>
    %19 = arith.divf %17, %18 : vector<8x128xf32>
    %20 = math.tanh %14 : vector<8x128xf32>
    %21 = vector.extract_strided_slice %19 {offsets = [0, 0], sizes = [8, 32], strides = [1, 1]} : vector<8x128xf32> to vector<8x32xf32>
    %22 = vector.extract_strided_slice %19 {offsets = [0, 32], sizes = [8, 32], strides = [1, 1]} : vector<8x128xf32> to vector<8x32xf32>
    %23 = vector.extract_strided_slice %20 {offsets = [0, 64], sizes = [8, 32], strides = [1, 1]} : vector<8x128xf32> to vector<8x32xf32>
    %24 = vector.extract_strided_slice %19 {offsets = [0, 96], sizes = [8, 32], strides = [1, 1]} : vector<8x128xf32> to vector<8x32xf32>
    %25 = arith.mulf %22, %9 : vector<8x32xf32>
    %26 = arith.mulf %21, %23 : vector<8x32xf32>
    %27 = arith.addf %25, %26 : vector<8x32xf32>
    %28 = math.tanh %27 : vector<8x32xf32>
    %29 = arith.mulf %24, %28 : vector<8x32xf32>
    %30 = vector.extract_strided_slice %7 {offsets = [1, 0, 0], sizes = [1, 8, 128], strides = [1, 1, 1]} : vector<8x8x128xf32> to vector<1x8x128xf32>
    %31 = vector.shape_cast %30 : vector<1x8x128xf32> to vector<8x128xf32>
    %32 = arith.truncf %29 : vector<8x32xf32> to vector<8x32xbf16>
    %cst_11 = arith.constant dense<0.000000e+00> : vector<8x128xf32>
    %33 = tpu.matmul %32, %0, %cst_11 {dimension_numbers = #tpu.dot_dimension_numbers<[1], [0], [0], [1], [0, 0, 1, 1], [], []>} : vector<8x32xbf16>, vector<32x128xbf16>, vector<8x128xf32> -> vector<8x128xf32>
    %34 = arith.addf %31, %33 : vector<8x128xf32>
    %35 = arith.negf %34 : vector<8x128xf32>
    %36 = math.exp %35 : vector<8x128xf32>
    %cst_12 = arith.constant 1.000000e+00 : f32
    %37 = vector.broadcast %cst_12 : f32 to vector<8x128xf32>
    %38 = arith.addf %37, %36 : vector<8x128xf32>
    %39 = arith.divf %37, %38 : vector<8x128xf32>
    %40 = math.tanh %34 : vector<8x128xf32>
    %41 = vector.extract_strided_slice %39 {offsets = [0, 0], sizes = [8, 32], strides = [1, 1]} : vector<8x128xf32> to vector<8x32xf32>
    %42 = vector.extract_strided_slice %39 {offsets = [0, 32], sizes = [8, 32], strides = [1, 1]} : vector<8x128xf32> to vector<8x32xf32>
    %43 = vector.extract_strided_slice %40 {offsets = [0, 64], sizes = [8, 32], strides = [1, 1]} : vector<8x128xf32> to vector<8x32xf32>
    %44 = vector.extract_strided_slice %39 {offsets = [0, 96], sizes = [8, 32], strides = [1, 1]} : vector<8x128xf32> to vector<8x32xf32>
    %45 = arith.mulf %42, %27 : vector<8x32xf32>
    %46 = arith.mulf %41, %43 : vector<8x32xf32>
    %47 = arith.addf %45, %46 : vector<8x32xf32>
    %48 = math.tanh %47 : vector<8x32xf32>
    %49 = arith.mulf %44, %48 : vector<8x32xf32>
    %50 = vector.extract_strided_slice %7 {offsets = [2, 0, 0], sizes = [1, 8, 128], strides = [1, 1, 1]} : vector<8x8x128xf32> to vector<1x8x128xf32>
    %51 = vector.shape_cast %50 : vector<1x8x128xf32> to vector<8x128xf32>
    %52 = arith.truncf %49 : vector<8x32xf32> to vector<8x32xbf16>
    %cst_13 = arith.constant dense<0.000000e+00> : vector<8x128xf32>
    %53 = tpu.matmul %52, %0, %cst_13 {dimension_numbers = #tpu.dot_dimension_numbers<[1], [0], [0], [1], [0, 0, 1, 1], [], []>} : vector<8x32xbf16>, vector<32x128xbf16>, vector<8x128xf32> -> vector<8x128xf32>
    %54 = arith.addf %51, %53 : vector<8x128xf32>
    %55 = arith.negf %54 : vector<8x128xf32>
    %56 = math.exp %55 : vector<8x128xf32>
    %cst_14 = arith.constant 1.000000e+00 : f32
    %57 = vector.broadcast %cst_14 : f32 to vector<8x128xf32>
    %58 = arith.addf %57, %56 : vector<8x128xf32>
    %59 = arith.divf %57, %58 : vector<8x128xf32>
    %60 = math.tanh %54 : vector<8x128xf32>
    %61 = vector.extract_strided_slice %59 {offsets = [0, 0], sizes = [8, 32], strides = [1, 1]} : vector<8x128xf32> to vector<8x32xf32>
    %62 = vector.extract_strided_slice %59 {offsets = [0, 32], sizes = [8, 32], strides = [1, 1]} : vector<8x128xf32> to vector<8x32xf32>
    %63 = vector.extract_strided_slice %60 {offsets = [0, 64], sizes = [8, 32], strides = [1, 1]} : vector<8x128xf32> to vector<8x32xf32>
    %64 = vector.extract_strided_slice %59 {offsets = [0, 96], sizes = [8, 32], strides = [1, 1]} : vector<8x128xf32> to vector<8x32xf32>
    %65 = arith.mulf %62, %47 : vector<8x32xf32>
    %66 = arith.mulf %61, %63 : vector<8x32xf32>
    %67 = arith.addf %65, %66 : vector<8x32xf32>
    %68 = math.tanh %67 : vector<8x32xf32>
    %69 = arith.mulf %64, %68 : vector<8x32xf32>
    %70 = vector.extract_strided_slice %7 {offsets = [3, 0, 0], sizes = [1, 8, 128], strides = [1, 1, 1]} : vector<8x8x128xf32> to vector<1x8x128xf32>
    %71 = vector.shape_cast %70 : vector<1x8x128xf32> to vector<8x128xf32>
    %72 = arith.truncf %69 : vector<8x32xf32> to vector<8x32xbf16>
    %cst_15 = arith.constant dense<0.000000e+00> : vector<8x128xf32>
    %73 = tpu.matmul %72, %0, %cst_15 {dimension_numbers = #tpu.dot_dimension_numbers<[1], [0], [0], [1], [0, 0, 1, 1], [], []>} : vector<8x32xbf16>, vector<32x128xbf16>, vector<8x128xf32> -> vector<8x128xf32>
    %74 = arith.addf %71, %73 : vector<8x128xf32>
    %75 = arith.negf %74 : vector<8x128xf32>
    %76 = math.exp %75 : vector<8x128xf32>
    %cst_16 = arith.constant 1.000000e+00 : f32
    %77 = vector.broadcast %cst_16 : f32 to vector<8x128xf32>
    %78 = arith.addf %77, %76 : vector<8x128xf32>
    %79 = arith.divf %77, %78 : vector<8x128xf32>
    %80 = math.tanh %74 : vector<8x128xf32>
    %81 = vector.extract_strided_slice %79 {offsets = [0, 0], sizes = [8, 32], strides = [1, 1]} : vector<8x128xf32> to vector<8x32xf32>
    %82 = vector.extract_strided_slice %79 {offsets = [0, 32], sizes = [8, 32], strides = [1, 1]} : vector<8x128xf32> to vector<8x32xf32>
    %83 = vector.extract_strided_slice %80 {offsets = [0, 64], sizes = [8, 32], strides = [1, 1]} : vector<8x128xf32> to vector<8x32xf32>
    %84 = vector.extract_strided_slice %79 {offsets = [0, 96], sizes = [8, 32], strides = [1, 1]} : vector<8x128xf32> to vector<8x32xf32>
    %85 = arith.mulf %82, %67 : vector<8x32xf32>
    %86 = arith.mulf %81, %83 : vector<8x32xf32>
    %87 = arith.addf %85, %86 : vector<8x32xf32>
    %88 = math.tanh %87 : vector<8x32xf32>
    %89 = arith.mulf %84, %88 : vector<8x32xf32>
    %90 = vector.extract_strided_slice %7 {offsets = [4, 0, 0], sizes = [1, 8, 128], strides = [1, 1, 1]} : vector<8x8x128xf32> to vector<1x8x128xf32>
    %91 = vector.shape_cast %90 : vector<1x8x128xf32> to vector<8x128xf32>
    %92 = arith.truncf %89 : vector<8x32xf32> to vector<8x32xbf16>
    %cst_17 = arith.constant dense<0.000000e+00> : vector<8x128xf32>
    %93 = tpu.matmul %92, %0, %cst_17 {dimension_numbers = #tpu.dot_dimension_numbers<[1], [0], [0], [1], [0, 0, 1, 1], [], []>} : vector<8x32xbf16>, vector<32x128xbf16>, vector<8x128xf32> -> vector<8x128xf32>
    %94 = arith.addf %91, %93 : vector<8x128xf32>
    %95 = arith.negf %94 : vector<8x128xf32>
    %96 = math.exp %95 : vector<8x128xf32>
    %cst_18 = arith.constant 1.000000e+00 : f32
    %97 = vector.broadcast %cst_18 : f32 to vector<8x128xf32>
    %98 = arith.addf %97, %96 : vector<8x128xf32>
    %99 = arith.divf %97, %98 : vector<8x128xf32>
    %100 = math.tanh %94 : vector<8x128xf32>
    %101 = vector.extract_strided_slice %99 {offsets = [0, 0], sizes = [8, 32], strides = [1, 1]} : vector<8x128xf32> to vector<8x32xf32>
    %102 = vector.extract_strided_slice %99 {offsets = [0, 32], sizes = [8, 32], strides = [1, 1]} : vector<8x128xf32> to vector<8x32xf32>
    %103 = vector.extract_strided_slice %100 {offsets = [0, 64], sizes = [8, 32], strides = [1, 1]} : vector<8x128xf32> to vector<8x32xf32>
    %104 = vector.extract_strided_slice %99 {offsets = [0, 96], sizes = [8, 32], strides = [1, 1]} : vector<8x128xf32> to vector<8x32xf32>
    %105 = arith.mulf %102, %87 : vector<8x32xf32>
    %106 = arith.mulf %101, %103 : vector<8x32xf32>
    %107 = arith.addf %105, %106 : vector<8x32xf32>
    %108 = math.tanh %107 : vector<8x32xf32>
    %109 = arith.mulf %104, %108 : vector<8x32xf32>
    %110 = vector.extract_strided_slice %7 {offsets = [5, 0, 0], sizes = [1, 8, 128], strides = [1, 1, 1]} : vector<8x8x128xf32> to vector<1x8x128xf32>
    %111 = vector.shape_cast %110 : vector<1x8x128xf32> to vector<8x128xf32>
    %112 = arith.truncf %109 : vector<8x32xf32> to vector<8x32xbf16>
    %cst_19 = arith.constant dense<0.000000e+00> : vector<8x128xf32>
    %113 = tpu.matmul %112, %0, %cst_19 {dimension_numbers = #tpu.dot_dimension_numbers<[1], [0], [0], [1], [0, 0, 1, 1], [], []>} : vector<8x32xbf16>, vector<32x128xbf16>, vector<8x128xf32> -> vector<8x128xf32>
    %114 = arith.addf %111, %113 : vector<8x128xf32>
    %115 = arith.negf %114 : vector<8x128xf32>
    %116 = math.exp %115 : vector<8x128xf32>
    %cst_20 = arith.constant 1.000000e+00 : f32
    %117 = vector.broadcast %cst_20 : f32 to vector<8x128xf32>
    %118 = arith.addf %117, %116 : vector<8x128xf32>
    %119 = arith.divf %117, %118 : vector<8x128xf32>
    %120 = math.tanh %114 : vector<8x128xf32>
    %121 = vector.extract_strided_slice %119 {offsets = [0, 0], sizes = [8, 32], strides = [1, 1]} : vector<8x128xf32> to vector<8x32xf32>
    %122 = vector.extract_strided_slice %119 {offsets = [0, 32], sizes = [8, 32], strides = [1, 1]} : vector<8x128xf32> to vector<8x32xf32>
    %123 = vector.extract_strided_slice %120 {offsets = [0, 64], sizes = [8, 32], strides = [1, 1]} : vector<8x128xf32> to vector<8x32xf32>
    %124 = vector.extract_strided_slice %119 {offsets = [0, 96], sizes = [8, 32], strides = [1, 1]} : vector<8x128xf32> to vector<8x32xf32>
    %125 = arith.mulf %122, %107 : vector<8x32xf32>
    %126 = arith.mulf %121, %123 : vector<8x32xf32>
    %127 = arith.addf %125, %126 : vector<8x32xf32>
    %128 = math.tanh %127 : vector<8x32xf32>
    %129 = arith.mulf %124, %128 : vector<8x32xf32>
    %130 = vector.extract_strided_slice %7 {offsets = [6, 0, 0], sizes = [1, 8, 128], strides = [1, 1, 1]} : vector<8x8x128xf32> to vector<1x8x128xf32>
    %131 = vector.shape_cast %130 : vector<1x8x128xf32> to vector<8x128xf32>
    %132 = arith.truncf %129 : vector<8x32xf32> to vector<8x32xbf16>
    %cst_21 = arith.constant dense<0.000000e+00> : vector<8x128xf32>
    %133 = tpu.matmul %132, %0, %cst_21 {dimension_numbers = #tpu.dot_dimension_numbers<[1], [0], [0], [1], [0, 0, 1, 1], [], []>} : vector<8x32xbf16>, vector<32x128xbf16>, vector<8x128xf32> -> vector<8x128xf32>
    %134 = arith.addf %131, %133 : vector<8x128xf32>
    %135 = arith.negf %134 : vector<8x128xf32>
    %136 = math.exp %135 : vector<8x128xf32>
    %cst_22 = arith.constant 1.000000e+00 : f32
    %137 = vector.broadcast %cst_22 : f32 to vector<8x128xf32>
    %138 = arith.addf %137, %136 : vector<8x128xf32>
    %139 = arith.divf %137, %138 : vector<8x128xf32>
    %140 = math.tanh %134 : vector<8x128xf32>
    %141 = vector.extract_strided_slice %139 {offsets = [0, 0], sizes = [8, 32], strides = [1, 1]} : vector<8x128xf32> to vector<8x32xf32>
    %142 = vector.extract_strided_slice %139 {offsets = [0, 32], sizes = [8, 32], strides = [1, 1]} : vector<8x128xf32> to vector<8x32xf32>
    %143 = vector.extract_strided_slice %140 {offsets = [0, 64], sizes = [8, 32], strides = [1, 1]} : vector<8x128xf32> to vector<8x32xf32>
    %144 = vector.extract_strided_slice %139 {offsets = [0, 96], sizes = [8, 32], strides = [1, 1]} : vector<8x128xf32> to vector<8x32xf32>
    %145 = arith.mulf %142, %127 : vector<8x32xf32>
    %146 = arith.mulf %141, %143 : vector<8x32xf32>
    %147 = arith.addf %145, %146 : vector<8x32xf32>
    %148 = math.tanh %147 : vector<8x32xf32>
    %149 = arith.mulf %144, %148 : vector<8x32xf32>
    %150 = vector.extract_strided_slice %7 {offsets = [7, 0, 0], sizes = [1, 8, 128], strides = [1, 1, 1]} : vector<8x8x128xf32> to vector<1x8x128xf32>
    %151 = vector.shape_cast %150 : vector<1x8x128xf32> to vector<8x128xf32>
    %152 = arith.truncf %149 : vector<8x32xf32> to vector<8x32xbf16>
    %cst_23 = arith.constant dense<0.000000e+00> : vector<8x128xf32>
    %153 = tpu.matmul %152, %0, %cst_23 {dimension_numbers = #tpu.dot_dimension_numbers<[1], [0], [0], [1], [0, 0, 1, 1], [], []>} : vector<8x32xbf16>, vector<32x128xbf16>, vector<8x128xf32> -> vector<8x128xf32>
    %154 = arith.addf %151, %153 : vector<8x128xf32>
    %155 = arith.negf %154 : vector<8x128xf32>
    %156 = math.exp %155 : vector<8x128xf32>
    %cst_24 = arith.constant 1.000000e+00 : f32
    %157 = vector.broadcast %cst_24 : f32 to vector<8x128xf32>
    %158 = arith.addf %157, %156 : vector<8x128xf32>
    %159 = arith.divf %157, %158 : vector<8x128xf32>
    %160 = math.tanh %154 : vector<8x128xf32>
    %161 = vector.extract_strided_slice %159 {offsets = [0, 0], sizes = [8, 32], strides = [1, 1]} : vector<8x128xf32> to vector<8x32xf32>
    %162 = vector.extract_strided_slice %159 {offsets = [0, 32], sizes = [8, 32], strides = [1, 1]} : vector<8x128xf32> to vector<8x32xf32>
    %163 = vector.extract_strided_slice %160 {offsets = [0, 64], sizes = [8, 32], strides = [1, 1]} : vector<8x128xf32> to vector<8x32xf32>
    %164 = vector.extract_strided_slice %159 {offsets = [0, 96], sizes = [8, 32], strides = [1, 1]} : vector<8x128xf32> to vector<8x32xf32>
    %165 = arith.mulf %162, %147 : vector<8x32xf32>
    %166 = arith.mulf %161, %163 : vector<8x32xf32>
    %167 = arith.addf %165, %166 : vector<8x32xf32>
    %168 = math.tanh %167 : vector<8x32xf32>
    %169 = arith.mulf %164, %168 : vector<8x32xf32>
    %c0_25 = arith.constant 0 : index
    %c0_26 = arith.constant 0 : index
    %170 = vector.load %arg4[%c0_25, %c0_26] : memref<1x32xf32, #tpu.memory_space<vmem>>, vector<1x32xf32>
    %171 = vector.broadcast %170 : vector<1x32xf32> to vector<8x32xf32>
    %172 = arith.mulf %169, %171 : vector<8x32xf32>
    %cst_27 = arith.constant dense<0.000000e+00> : vector<8xf32>
    %173 = vector.multi_reduction <add>, %172, %cst_27 [1] : vector<8x32xf32> to vector<8xf32>
    %174 = vector.shape_cast %173 : vector<8xf32> to vector<8x1xf32>
    %c0_28 = arith.constant 0 : index
    %175 = memref.load %arg5[%c0_28] : memref<1xf32, #tpu.memory_space<smem>>
    %176 = vector.broadcast %175 : f32 to vector<8x1xf32>
    %177 = arith.addf %174, %176 : vector<8x1xf32>
    %c0_29 = arith.constant 0 : index
    %c0_30 = arith.constant 0 : index
    %178 = vector.load %arg6[%c0_29, %c0_30] : memref<8x1xf32, #tpu.memory_space<vmem>>, vector<8x1xf32>
    tpu.vector_store %arg6[%c0_29, %c0_30], %177 {strides = array<i32>} : memref<8x1xf32, #tpu.memory_space<vmem>>, vector<8x1xf32>,
    return
  }
}

</mosaic_0001>

<bundles_post_ra>
// kernel: tpu_custom_call.1
= control target key start
LH: loop header
LB: loop body
LE: loop exit
PB: predicated region body
PF: predicated region fallthrough
CT: control target
= control target key end

     0   :  { %v969_v0 = vmov 0.0   ;;  %vm970_vm0 = vmmov 0   ;;  %vm72_vm1 = vcmask 130048   ;;  %v971_v6 = vmov 0   ;;  %s972_s7 = smov 64   ;;  %s974_s13 = smov 96   ;;  %s1167_s1 = inlined_call_operand.vmem [shape: bf16[16,128], index: 1, kind: input, shape index: {}]   ;;  %s1168_s2 = inlined_call_operand.vmem [shape: bf16[32,128], index: 2, kind: input, shape index: {}]   ;;  %s1169_s0 = inlined_call_operand.vmem [shape: bf16[64,16], index: 0, kind: input, shape index: {}]   ;;  %s1170_s3 = inlined_call_operand.vmem [shape: f32[1,128], index: 3, kind: input, shape index: {}]   ;;  %s1171_s4 = inlined_call_operand.vmem [shape: f32[1,32], index: 4, kind: input, shape index: {}]   ;;  %s1172_s5 = inlined_call_operand.<no memory space> [shape: f32[1], index: 5, kind: input, shape index: {}]   ;;  %s1173_s6 = inlined_call_operand.vmem [shape: f32[8,1], index: 6, kind: output, shape index: {}]  }
   0x1   :  { %828 = vmatprep.subr.bf16.mxu1 %v969_v0  ;;  %v898_v1 = vld [vmem:[%s1167_s1] sm:$0xff]   ;;  %832 = vmatprep.mubr.msk.bf16.mxu1 %vm970_vm0, %v969_v0  ;;  %v901_v4 = vld [vmem:[%s1169_s0 + $0x8] sm:$0xff]   ;;  %vm162_vm2 = vcmask 261120   ;;  %v903_v49 = vld [vmem:[%s1169_s0 + $0x10] sm:$0xff]   ;;  %vm755_vm3 = vcmask 7168  }
   0x2   :  { %v1019_v2 = vld [vmem:[%s1168_s2] sm:$0xff]   ;;  %818 = vmatprep.subr.bf16.mxu0 %v898_v1  ;;  %v1033_v5 = vld [vmem:[%s1168_s2 + $0x8] sm:$0xff]   ;;  %v904_v50 = vld [vmem:[%s1169_s0 + $0x18] sm:$0xff]  }
   0x3   :  { %v900_v3 = vld [vmem:[%s1169_s0] sm:$0xff]   ;;  %829 = vmatpush3.bf16.msra.mxu1 %v1019_v2  ;;  %819 = vmatpush3.bf16.msra.mxu0 %v898_v1 }
   0x4   :  { %820 = vmatprep.mubr.msk.bf16.mxu0 %vm72_vm1, %v900_v3  ;;  %830 = vmatprep.subr.bf16.mxu1 %v969_v0  ;;  %v1052_v7 = vld [vmem:[%s1170_s3] ss:$0 sm:$0xff]  ;;  %s973_s3 = smov 32  }
   0x5   :  { %844 = vmatprep.subr.bf16.mxu0 %v969_v0 }
   0x6   :  { %821 = vmatmul.mubr.msk.bf16.vlgmr.msra.gmra.mrb[0].mxu0 %vm72_vm1, %v901_v4 }
   0x7   :  { %831 = vmatpush3.bf16.msra.mxu1 %v1033_v5  ;;  %845 = vmatpush3.bf16.msra.mxu0 %v1019_v2 }
   0x8   :  { %836 = vmatprep.subr.bf16.mxu1 %v969_v0  ;;  %846 = vmatprep.subr.bf16.mxu0 %v969_v0 }
   0x9   :  { %824 = vmatprep.mubr.msk.bf16.mxu0 %vm72_vm1, %v903_v49 }
   0xa   :  { %833 = vmatmul.mubr.bf16.vlgmr.msra.gmra.mrb[0].mxu1 %v971_v6 }
   0xb   :  { %837 = vmatpush3.bf16.msra.mxu1 %v1019_v2  ;;  %840 = vmatprep.mubr.msk.bf16.mxu1 %vm970_vm0, %v969_v0 }
   0xc   :  { %838 = vmatprep.subr.bf16.mxu1 %v969_v0  ;;  %847 = vmatpush3.bf16.msra.mxu0 %v1033_v5 }
   0xd   :  { %860 = vmatprep.subr.bf16.mxu0 %v969_v0 }
   0xe   :  { %825 = vmatmul.mubr.msk.bf16.gmra.mrb[4].mxu0 %vm72_vm1, %v904_v50 }
   0xf   :  { %839 = vmatpush3.bf16.msra.mxu1 %v1033_v5  ;;  %848 = vmatprep.mubr.msk.bf16.mxu0 %vm970_vm0, %v969_v0 }
  0x10   :  { %852 = vmatprep.subr.bf16.mxu1 %v969_v0 }
  0xd9   :  { %v1054_v8 = vpop.f32.mrb[0].mxu0 }
  0xda   :  { %v119_v9 = vpop.f32.mrb[1].mxu0  ;;  %v128_v60 = vadd.f32 %v1054_v8, %v1052_v7 }
  0xdb   :  { %v120_v10 = vadd.f32 %v1052_v7, %v119_v9  ;;  %v1057_v11 = vpop.f32.mrb[2].mxu0 }
  0xdc   :  { %v122_v12 = vpop.f32.mrb[3].mxu0 }
  0xdd   :  { %v200_v13 = vpop.f32.mrb[0].mxu1  ;;  %v123_v33 = vadd.f32 %v1052_v7, %v122_v12 }
  0xde   :  { %v206_v14 = vadd.f32 %v200_v13, %v120_v10  ;;  %v834_v15 = vpop.f32.mrb[1].mxu1 }
  0xdf   :  { %v203_v16 = vpop.f32.mrb[2].mxu1 }
  0xe0   :  { %905 = vtanh.f32 %v206_v14  ;;  %v835_v17 = vpop.f32.mrb[3].mxu1  ;;  %v773_v19 = vmul.f32 -1.442695, %v206_v14 }
  0xe1   :  { %v1085_v55 = vpop.f32.mrb[4].mxu0 }
  0xe2   :  { %907 = vpow2.f32 %v773_v19  ;;  %v1087_v56 = vpop.f32.mrb[5].mxu0 }
  0xe3   :  { %v1089_v57 = vpop.f32.mrb[6].mxu0 }
  0xe4   :  { %v1091_v58 = vpop.f32.mrb[7].mxu0 }
  0xea   :  { %v906_v18 = vpop.eup %905 }
  0xeb   :  { %216 = vrot.lane.b32.xlu0 %v906_v18, %s972_s7 }
  0xec   :  { %v908_v20 = vpop.eup %907 }
  0xed   :  { %v210_v21 = vadd.f32 1.0, %v908_v20 }
  0xef   :  { %909 = vrcp.f32 %v210_v21 }
  0xf9   :  { %v910_v22 = vpop.eup %909 }
  0xfa   :  { %v214_v25 = vmul.f32 0.0, %v910_v22 }
 0x15d   :  { %v217_v23 = vpop.permute.xlu0 %216 }
 0x15e   :  { %v219_v24 = vmul.f32 %v910_v22, %v217_v23 }
 0x160   :  { %221 = vrot.lane.b32.xlu0 %v219_v24, %s973_s3 }
 0x1d2   :  { %v222_v26 = vpop.permute.xlu0 %221 }
 0x1d3   :  { %v224_v27 = vadd.f32 %v222_v26, %v214_v25 }
 0x1d5   :  { %911 = vtanh.f32 %v224_v27 }
 0x1df   :  { %v912_v28 = vpop.eup %911 }
 0x1e0   :  { %227 = vrot.lane.b32.xlu1 %v912_v28, %s972_s7 }
 0x252   :  { %v228_v29 = vpop.permute.xlu1 %227 }
 0x253   :  { %v230_v30 = vmul.f32 %v910_v22, %v228_v29  ;;  %v131_v22 = vadd.f32 %v1057_v11, %v1052_v7 }
 0x255   :  { %v231_v31 = vpack.c.bf16 %v230_v30, %v230_v30 }
 0x257   :  { %233 = vrot.lane.b32.xlu1 %v231_v31, %s973_s3 }
 0x2c9   :  { %v234_v32 = vpop.permute.xlu1 %233 }
 0x2ca   :  { %841 = vmatmul.mubr.msk.bf16.vlgmr.msra.gmra.mrb[4].mxu1 %vm162_vm2, %v234_v32 }
 0x2cb   :  { %853 = vmatpush3.bf16.msra.mxu1 %v1019_v2  ;;  %856 = vmatprep.mubr.msk.bf16.mxu1 %vm970_vm0, %v969_v0 }
 0x2cc   :  { %854 = vmatprep.subr.bf16.mxu1 %v969_v0 }
 0x2cf   :  { %855 = vmatpush3.bf16.msra.mxu1 %v1033_v5 }
 0x2d0   :  { %868 = vmatprep.subr.bf16.mxu1 %v969_v0 }
 0x39d   :  { %v272_v34 = vpop.f32.mrb[4].mxu1 }
 0x39e   :  { %v278_v35 = vadd.f32 %v272_v34, %v123_v33  ;;  %v842_v36 = vpop.f32.mrb[5].mxu1 }
 0x39f   :  { %v275_v37 = vpop.f32.mrb[6].mxu1 }
 0x3a0   :  { %913 = vtanh.f32 %v278_v35  ;;  %v843_v38 = vpop.f32.mrb[7].mxu1  ;;  %v775_v40 = vmul.f32 -1.442695, %v278_v35 }
 0x3a2   :  { %915 = vpow2.f32 %v775_v40 }
 0x3aa   :  { %v914_v39 = vpop.eup %913 }
 0x3ab   :  { %288 = vrot.lane.b32.xlu0 %v914_v39, %s972_s7 }
 0x3ac   :  { %v916_v41 = vpop.eup %915 }
 0x3ad   :  { %v282_v42 = vadd.f32 1.0, %v916_v41 }
 0x3af   :  { %917 = vrcp.f32 %v282_v42  ;;  %v136_v42 = vadd.f32 %v1052_v7, %v1087_v56 }
 0x3b9   :  { %v918_v43 = vpop.eup %917 }
 0x3ba   :  { %v286_v46 = vmul.f32 %v918_v43, %v224_v27 }
 0x41d   :  { %v289_v44 = vpop.permute.xlu0 %288 }
 0x41e   :  { %v291_v45 = vmul.f32 %v918_v43, %v289_v44 }
 0x420   :  { %293 = vrot.lane.b32.xlu1 %v291_v45, %s973_s3 }
 0x492   :  { %v294_v47 = vpop.permute.xlu1 %293 }
 0x493   :  { %v296_v48 = vadd.f32 %v294_v47, %v286_v46 }
 0x495   :  { %919 = vtanh.f32 %v296_v48 }
 0x49f   :  { %v920_v51 = vpop.eup %919 }
 0x4a0   :  { %299 = vrot.lane.b32.xlu0 %v920_v51, %s972_s7 }
 0x512   :  { %v300_v52 = vpop.permute.xlu0 %299 }
 0x513   :  { %v302_v53 = vmul.f32 %v918_v43, %v300_v52 }
 0x515   :  { %v303_v54 = vpack.c.bf16 %v302_v53, %v302_v53 }
 0x517   :  { %305 = vrot.lane.b32.xlu1 %v303_v54, %s973_s3 }
 0x589   :  { %v306_v59 = vpop.permute.xlu1 %305 }
 0x58a   :  { %849 = vmatmul.mubr.msk.bf16.vlgmr.msra.gmra.mrb[8].mxu0 %vm162_vm2, %v306_v59 }
 0x58b   :  { %861 = vmatpush3.bf16.msra.mxu0 %v1019_v2  ;;  %864 = vmatprep.mubr.msk.bf16.mxu0 %vm970_vm0, %v969_v0 }
 0x58c   :  { %862 = vmatprep.subr.bf16.mxu0 %v969_v0 }
 0x58f   :  { %863 = vmatpush3.bf16.msra.mxu0 %v1033_v5 }
 0x590   :  { %876 = vmatprep.subr.bf16.mxu0 %v969_v0 }
 0x65d   :  { %v344_v61 = vpop.f32.mrb[8].mxu0 }
 0x65e   :  { %v350_v62 = vadd.f32 %v344_v61, %v128_v60  ;;  %v850_v63 = vpop.f32.mrb[9].mxu0 }
 0x65f   :  { %v347_v1 = vpop.f32.mrb[10].mxu0 }
 0x660   :  { %921 = vtanh.f32 %v350_v62  ;;  %v851_v3 = vpop.f32.mrb[11].mxu0  ;;  %v777_v6 = vmul.f32 -1.442695, %v350_v62 }
 0x662   :  { %923 = vpow2.f32 %v777_v6 }
 0x66a   :  { %v922_v4 = vpop.eup %921 }
 0x66b   :  { %360 = vrot.lane.b32.xlu0 %v922_v4, %s972_s7  ;;  %v139_v4 = vadd.f32 %v1052_v7, %v1091_v58 }
 0x66c   :  { %v924_v9 = vpop.eup %923 }
 0x66d   :  { %v354_v10 = vadd.f32 1.0, %v924_v9 }
 0x66f   :  { %925 = vrcp.f32 %v354_v10 }
 0x679   :  { %v926_v12 = vpop.eup %925 }
 0x67a   :  { %v358_v8 = vmul.f32 %v926_v12, %v296_v48 }
 0x6dd   :  { %v361_v13 = vpop.permute.xlu0 %360 }
 0x6de   :  { %v363_v14 = vmul.f32 %v926_v12, %v361_v13 }
 0x6e0   :  { %365 = vrot.lane.b32.xlu1 %v363_v14, %s973_s3 }
 0x752   :  { %v366_v15 = vpop.permute.xlu1 %365 }
 0x753   :  { %v368_v16 = vadd.f32 %v366_v15, %v358_v8 }
 0x755   :  { %927 = vtanh.f32 %v368_v16 }
 0x75f   :  { %v928_v17 = vpop.eup %927 }
 0x760   :  { %371 = vrot.lane.b32.xlu0 %v928_v17, %s972_s7 }
 0x7d2   :  { %v372_v18 = vpop.permute.xlu0 %371 }
 0x7d3   :  { %v374_v19 = vmul.f32 %v926_v12, %v372_v18 }
 0x7d5   :  { %v375_v20 = vpack.c.bf16 %v374_v19, %v374_v19 }
 0x7d7   :  { %377 = vrot.lane.b32.xlu1 %v375_v20, %s973_s3 }
 0x849   :  { %v378_v21 = vpop.permute.xlu1 %377 }
 0x84a   :  { %857 = vmatmul.mubr.msk.bf16.vlgmr.msra.gmra.mrb[8].mxu1 %vm162_vm2, %v378_v21 }
 0x84b   :  { %869 = vmatpush3.bf16.msra.mxu1 %v1019_v2  ;;  %872 = vmatprep.mubr.msk.bf16.mxu1 %vm970_vm0, %v969_v0 }
 0x84c   :  { %870 = vmatprep.subr.bf16.mxu1 %v969_v0 }
 0x84f   :  { %871 = vmatpush3.bf16.msra.mxu1 %v1033_v5 }
 0x850   :  { %884 = vmatprep.subr.bf16.mxu1 %v969_v0 }
 0x91d   :  { %v416_v23 = vpop.f32.mrb[8].mxu1 }
 0x91e   :  { %v422_v24 = vadd.f32 %v416_v23, %v131_v22  ;;  %v858_v25 = vpop.f32.mrb[9].mxu1 }
 0x91f   :  { %v419_v26 = vpop.f32.mrb[10].mxu1 }
 0x920   :  { %929 = vtanh.f32 %v422_v24  ;;  %v859_v27 = vpop.f32.mrb[11].mxu1  ;;  %v779_v29 = vmul.f32 -1.442695, %v422_v24  ;;  %v144_v24 = vadd.f32 %v1085_v55, %v1052_v7 }
 0x922   :  { %931 = vpow2.f32 %v779_v29 }
 0x92a   :  { %v930_v28 = vpop.eup %929 }
 0x92b   :  { %432 = vrot.lane.b32.xlu0 %v930_v28, %s972_s7 }
 0x92c   :  { %v932_v30 = vpop.eup %931 }
 0x92d   :  { %v426_v31 = vadd.f32 1.0, %v932_v30 }
 0x92f   :  { %933 = vrcp.f32 %v426_v31 }
 0x939   :  { %v934_v32 = vpop.eup %933 }
 0x93a   :  { %v430_v11 = vmul.f32 %v934_v32, %v368_v16 }
 0x99d   :  { %v433_v33 = vpop.permute.xlu0 %432 }
 0x99e   :  { %v435_v34 = vmul.f32 %v934_v32, %v433_v33 }
 0x9a0   :  { %437 = vrot.lane.b32.xlu1 %v435_v34, %s973_s3 }
 0xa12   :  { %v438_v35 = vpop.permute.xlu1 %437 }
 0xa13   :  { %v440_v36 = vadd.f32 %v438_v35, %v430_v11 }
 0xa15   :  { %935 = vtanh.f32 %v440_v36 }
 0xa1f   :  { %v936_v37 = vpop.eup %935 }
 0xa20   :  { %443 = vrot.lane.b32.xlu0 %v936_v37, %s972_s7 }
 0xa92   :  { %v444_v38 = vpop.permute.xlu0 %443 }
 0xa93   :  { %v446_v39 = vmul.f32 %v934_v32, %v444_v38 }
 0xa95   :  { %v447_v40 = vpack.c.bf16 %v446_v39, %v446_v39 }
 0xa97   :  { %449 = vrot.lane.b32.xlu1 %v447_v40, %s973_s3 }
 0xb09   :  { %v450_v41 = vpop.permute.xlu1 %449 }
 0xb0a   :  { %865 = vmatmul.mubr.msk.bf16.vlgmr.msra.gmra.mrb[12].mxu0 %vm162_vm2, %v450_v41 }
 0xb0b   :  { %877 = vmatpush3.bf16.msra.mxu0 %v1019_v2  ;;  %880 = vmatprep.mubr.msk.bf16.mxu0 %vm970_vm0, %v969_v0 }
 0xb0c   :  { %878 = vmatprep.subr.bf16.mxu0 %v969_v0 }
 0xb0f   :  { %879 = vmatpush3.bf16.msra.mxu0 %v1033_v5 }
 0xbdd   :  { %v488_v43 = vpop.f32.mrb[12].mxu0 }
 0xbde   :  { %v494_v44 = vadd.f32 %v488_v43, %v136_v42  ;;  %v866_v45 = vpop.f32.mrb[13].mxu0  ;;  %v147_v43 = vadd.f32 %v1089_v57, %v1052_v7  ;;  %v788_v7 = vld [vmem:[%s1171_s4] ss:$0 sm:$0xff] }
 0xbdf   :  { %v491_v46 = vpop.f32.mrb[14].mxu0 }
 0xbe0   :  { %937 = vtanh.f32 %v494_v44  ;;  %v867_v47 = vpop.f32.mrb[15].mxu0  ;;  %v781_v49 = vmul.f32 -1.442695, %v494_v44 }
 0xbe2   :  { %939 = vpow2.f32 %v781_v49 }
 0xbea   :  { %v938_v48 = vpop.eup %937 }
 0xbeb   :  { %504 = vrot.lane.b32.xlu0 %v938_v48, %s972_s7 }
 0xbec   :  { %v940_v50 = vpop.eup %939 }
 0xbed   :  { %v498_v51 = vadd.f32 1.0, %v940_v50 }
 0xbef   :  { %941 = vrcp.f32 %v498_v51 }
 0xbf9   :  { %v942_v52 = vpop.eup %941 }
 0xbfa   :  { %v502_v56 = vmul.f32 %v942_v52, %v440_v36 }
 0xc5d   :  { %v505_v53 = vpop.permute.xlu0 %504 }
 0xc5e   :  { %v507_v54 = vmul.f32 %v942_v52, %v505_v53 }
 0xc60   :  { %509 = vrot.lane.b32.xlu1 %v507_v54, %s973_s3 }
 0xcd2   :  { %v510_v59 = vpop.permute.xlu1 %509 }
 0xcd3   :  { %v512_v60 = vadd.f32 %v510_v59, %v502_v56 }
 0xcd5   :  { %943 = vtanh.f32 %v512_v60 }
 0xcdf   :  { %v944_v61 = vpop.eup %943 }
 0xce0   :  { %515 = vrot.lane.b32.xlu0 %v944_v61, %s972_s7 }
 0xd52   :  { %v516_v62 = vpop.permute.xlu0 %515 }
 0xd53   :  { %v518_v63 = vmul.f32 %v942_v52, %v516_v62 }
 0xd55   :  { %v519_v1 = vpack.c.bf16 %v518_v63, %v518_v63 }
 0xd57   :  { %521 = vrot.lane.b32.xlu1 %v519_v1, %s973_s3 }
 0xdc9   :  { %v522_v3 = vpop.permute.xlu1 %521 }
 0xdca   :  { %873 = vmatmul.mubr.msk.bf16.vlgmr.msra.gmra.mrb[12].mxu1 %vm162_vm2, %v522_v3 }
 0xdcb   :  { %885 = vmatpush3.bf16.msra.mxu1 %v1019_v2  ;;  %888 = vmatprep.mubr.msk.bf16.mxu1 %vm970_vm0, %v969_v0 }
 0xdcc   :  { %886 = vmatprep.subr.bf16.mxu1 %v969_v0 }
 0xdcf   :  { %887 = vmatpush3.bf16.msra.mxu1 %v1033_v5 }
 0xe9d   :  { %v560_v6 = vpop.f32.mrb[12].mxu1 }
 0xe9e   :  { %v566_v9 = vadd.f32 %v560_v6, %v139_v4  ;;  %v874_v10 = vpop.f32.mrb[13].mxu1 }
 0xe9f   :  { %v563_v12 = vpop.f32.mrb[14].mxu1 }
 0xea0   :  { %945 = vtanh.f32 %v566_v9  ;;  %v875_v13 = vpop.f32.mrb[15].mxu1  ;;  %v783_v2 = vmul.f32 -1.442695, %v566_v9  ;;  %v753_v9 = vstv %s1172_s5 }
 0xea2   :  { %947 = vpow2.f32 %v783_v2 }
 0xeaa   :  { %v946_v14 = vpop.eup %945 }
 0xeab   :  { %576 = vrot.lane.b32.xlu0 %v946_v14, %s972_s7 }
 0xeac   :  { %v948_v8 = vpop.eup %947 }
 0xead   :  { %v570_v15 = vadd.f32 1.0, %v948_v8 }
 0xeaf   :  { %949 = vrcp.f32 %v570_v15 }
 0xeb9   :  { %v950_v0 = vpop.eup %949 }
 0xeba   :  { %v574_v58 = vmul.f32 %v950_v0, %v512_v60 }
 0xf1d   :  { %v577_v16 = vpop.permute.xlu0 %576 }
 0xf1e   :  { %v579_v5 = vmul.f32 %v950_v0, %v577_v16 }
 0xf20   :  { %581 = vrot.lane.b32.xlu1 %v579_v5, %s973_s3 }
 0xf92   :  { %v582_v17 = vpop.permute.xlu1 %581 }
 0xf93   :  { %v584_v18 = vadd.f32 %v582_v17, %v574_v58 }
 0xf95   :  { %951 = vtanh.f32 %v584_v18 }
 0xf9f   :  { %v952_v19 = vpop.eup %951 }
 0xfa0   :  { %587 = vrot.lane.b32.xlu0 %v952_v19, %s972_s7 }
0x1012   :  { %v588_v20 = vpop.permute.xlu0 %587 }
0x1013   :  { %v590_v21 = vmul.f32 %v950_v0, %v588_v20 }
0x1015   :  { %v591_v22 = vpack.c.bf16 %v590_v21, %v590_v21 }
0x1017   :  { %593 = vrot.lane.b32.xlu1 %v591_v22, %s973_s3 }
0x1089   :  { %v594_v23 = vpop.permute.xlu1 %593 }
0x108a   :  { %881 = vmatmul.mubr.msk.bf16.vlgmr.msra.gmra.mrb[16].mxu0 %vm162_vm2, %v594_v23 }
0x115d   :  { %v632_v25 = vpop.f32.mrb[16].mxu0 }
0x115e   :  { %v638_v26 = vadd.f32 %v632_v25, %v144_v24  ;;  %v882_v27 = vpop.f32.mrb[17].mxu0 }
0x115f   :  { %v635_v28 = vpop.f32.mrb[18].mxu0 }
0x1160   :  { %953 = vtanh.f32 %v638_v26  ;;  %v883_v29 = vpop.f32.mrb[19].mxu0  ;;  %v785_v31 = vmul.f32 -1.442695, %v638_v26 }
0x1162   :  { %955 = vpow2.f32 %v785_v31 }
0x116a   :  { %v954_v30 = vpop.eup %953 }
0x116b   :  { %648 = vrot.lane.b32.xlu0 %v954_v30, %s972_s7 }
0x116c   :  { %v956_v32 = vpop.eup %955 }
0x116d   :  { %v642_v33 = vadd.f32 1.0, %v956_v32 }
0x116f   :  { %957 = vrcp.f32 %v642_v33 }
0x1179   :  { %v958_v34 = vpop.eup %957 }
0x117a   :  { %v646_v55 = vmul.f32 %v958_v34, %v584_v18 }
0x11dd   :  { %v649_v11 = vpop.permute.xlu0 %648 }
0x11de   :  { %v651_v35 = vmul.f32 %v958_v34, %v649_v11 }
0x11e0   :  { %653 = vrot.lane.b32.xlu1 %v651_v35, %s973_s3 }
0x1252   :  { %v654_v36 = vpop.permute.xlu1 %653 }
0x1253   :  { %v656_v37 = vadd.f32 %v654_v36, %v646_v55 }
0x1255   :  { %959 = vtanh.f32 %v656_v37 }
0x125f   :  { %v960_v38 = vpop.eup %959 }
0x1260   :  { %659 = vrot.lane.b32.xlu0 %v960_v38, %s972_s7 }
0x12d2   :  { %v660_v39 = vpop.permute.xlu0 %659 }
0x12d3   :  { %v662_v40 = vmul.f32 %v958_v34, %v660_v39 }
0x12d5   :  { %v663_v41 = vpack.c.bf16 %v662_v40, %v662_v40 }
0x12d7   :  { %665 = vrot.lane.b32.xlu1 %v663_v41, %s973_s3 }
0x1349   :  { %v666_v42 = vpop.permute.xlu1 %665 }
0x134a   :  { %889 = vmatmul.mubr.msk.bf16.vlgmr.msra.gmra.mrb[16].mxu1 %vm162_vm2, %v666_v42 }
0x141d   :  { %v704_v44 = vpop.f32.mrb[16].mxu1 }
0x141e   :  { %v710_v45 = vadd.f32 %v704_v44, %v147_v43  ;;  %v890_v46 = vpop.f32.mrb[17].mxu1 }
0x141f   :  { %v707_v47 = vpop.f32.mrb[18].mxu1 }
0x1420   :  { %961 = vtanh.f32 %v710_v45  ;;  %v891_v48 = vpop.f32.mrb[19].mxu1  ;;  %v787_v50 = vmul.f32 -1.442695, %v710_v45 }
0x1422   :  { %963 = vpow2.f32 %v787_v50 }
0x142a   :  { %v962_v49 = vpop.eup %961 }
0x142b   :  { %720 = vrot.lane.b32.xlu0 %v962_v49, %s972_s7 }
0x142c   :  { %v964_v51 = vpop.eup %963 }
0x142d   :  { %v714_v52 = vadd.f32 1.0, %v964_v51 }
0x142f   :  { %965 = vrcp.f32 %v714_v52 }
0x1439   :  { %v966_v53 = vpop.eup %965 }
0x143a   :  { %v718_v57 = vmul.f32 %v966_v53, %v656_v37 }
0x149d   :  { %v721_v54 = vpop.permute.xlu0 %720 }
0x149e   :  { %v723_v56 = vmul.f32 %v966_v53, %v721_v54 }
0x14a0   :  { %725 = vrot.lane.b32.xlu1 %v723_v56, %s973_s3 }
0x14a4   :  { %741 = vrot.lane.b32.xlu1 %v788_v7, %s974_s13 }
0x1512   :  { %v726_v59 = vpop.permute.xlu1 %725 }
0x1513   :  { %v728_v60 = vadd.f32 %v726_v59, %v718_v57 }
0x1515   :  { %967 = vtanh.f32 %v728_v60 }
0x1516   :  { %v742_v63 = vpop.permute.xlu1 %741 }
0x151f   :  { %v968_v61 = vpop.eup %967 }
0x1520   :  { %731 = vrot.lane.b32.xlu0 %v968_v61, %s972_s7 }
0x1592   :  { %v732_v62 = vpop.permute.xlu0 %731 }
0x1593   :  { %v734_v1 = vmul.f32 %v966_v53, %v732_v62 }
0x1595   :  { %v744_v3 = vmul.f32 %v742_v63, %v734_v1 }
0x1597   :  { %746 = vrot.lane.b32.xlu0 %v744_v3, %s973_s3 }
0x1609   :  { %v747_v4 = vpop.permute.xlu0 %746 }
0x160a   :  { %v749_v6 = vsel %vm162_vm2, %v747_v4, 0.0 }
0x160b   :  { %750 = vadd.xlane.f32.xlu1 %v749_v6 }
0x1698   :  { %v751_v10 = vpop.xlane.xlu1 %750 }
0x1699   :  { %v754_v12 = vadd.f32 %v753_v9, %v751_v10 }
0x169b   :  { %756 = vst.msk [vmem:[%s1173_s6] sm:$0xff] %vm755_vm3, %v754_v12 }

</bundles_post_ra>
